<compile_context>
chip_gen: v7x
topology: tpu7x:2x2x1
jax: 0.10.0
libtpu: 0.0.40
codegen_flags: <defaults>
</compile_context>

<pallas_src>
import functools
import math

import jax
import jax.numpy as jnp
from jax.experimental import pallas as pl
from jax.experimental.pallas import tpu as pltpu


# --------------------------------------------------------------------------
# shared helpers
# --------------------------------------------------------------------------
def _layernorm(x, gamma, beta, eps):
    mu = jnp.mean(x, axis=-1, keepdims=True)
    var = jnp.mean(jnp.square(x - mu), axis=-1, keepdims=True)
    return (x - mu) * jax.lax.rsqrt(var + eps) * gamma + beta


def _vmem_limit(block_bytes):
    # advisory scoped-VMEM limit: double-buffered blocks + slack, clamped.
    return int(min(96 * 2**20, max(32 * 2**20, 2 * block_bytes + (4 << 20))))


# --------------------------------------------------------------------------
# kernel 1: embedding sum -> LayerNorm (self.layer_norm, eps=1e-5),
# tiled over token rows.
# --------------------------------------------------------------------------
def embed_ln_kernel(e_ref, g_ref, b_ref, o_ref):
    x = e_ref[...].astype(jnp.float32)                        # [TR, E]
    o_ref[...] = _layernorm(x, g_ref[0], b_ref[0], 1e-5).astype(o_ref.dtype)


# --------------------------------------------------------------------------
# kernel 2: fused L-layer nn.TransformerEncoder (post-LN, ReLU, eps=1e-12).
# grid = (batch, layer); layer weights are selected by the layer grid axis
# and the residual stream stays resident in a VMEM f32 scratch across layers.
# --------------------------------------------------------------------------
def encoder_stack_kernel(x_ref, mask_ref,
                         wqkv_ref, bqkv_ref, wo_ref, bo_ref,
                         ln1g_ref, ln1b_ref,
                         w1_ref, b1_ref, w2_ref, b2_ref,
                         ln2g_ref, ln2b_ref,
                         o_ref, h_ref, *, n_head):
    l = pl.program_id(1)

    @pl.when(l == 0)
    def _():
        h_ref[...] = x_ref[0].astype(jnp.float32)

    x = h_ref[...]                                            # [S, E] f32 residual
    S, E = x.shape
    dh = E // n_head
    scale = 1.0 / math.sqrt(dh)

    xb = x.astype(jnp.bfloat16)
    xh = jnp.broadcast_to(xb[None], (n_head, S, E))           # shared across heads

    # fused per-head in-projection: [H, S, 3*dh], f32 accumulation
    qkv = jnp.einsum('hse,hef->hsf', xh, wqkv_ref[0],
                     preferred_element_type=jnp.float32) + bqkv_ref[0]
    q = qkv[:, :, :dh].astype(jnp.bfloat16)
    k = qkv[:, :, dh:2 * dh].astype(jnp.bfloat16)
    v = qkv[:, :, 2 * dh:].astype(jnp.bfloat16)

    # scores + torch's additive float attn_mask (broadcast over heads)
    s = jnp.einsum('hqd,hkd->hqk', q, k,
                   preferred_element_type=jnp.float32) * scale
    s = s + mask_ref[...]                                     # [1,S,S] -> [H,S,S]
    s = s - jnp.max(s, axis=-1, keepdims=True)
    p = jnp.exp(s)
    p = p * pl.reciprocal(jnp.sum(p, axis=-1, keepdims=True), approx=True)

    ctx = jnp.einsum('hqk,hkd->hqd', p.astype(jnp.bfloat16), v,
                     preferred_element_type=jnp.float32)      # [H, S, dh]
    attn = jnp.sum(
        jnp.einsum('hsd,hde->hse', ctx.astype(jnp.bfloat16), wo_ref[0],
                   preferred_element_type=jnp.float32), axis=0) + bo_ref[0]
    # dropout: identity (inference)
    h1 = _layernorm(x + attn, ln1g_ref[0], ln1b_ref[0], 1e-12)

    ff = jnp.dot(h1.astype(jnp.bfloat16), w1_ref[0],
                 preferred_element_type=jnp.float32) + b1_ref[0]
    ff = jnp.maximum(ff, 0.0)                                 # torch default: relu
    ff = jnp.dot(ff.astype(jnp.bfloat16), w2_ref[0],
                 preferred_element_type=jnp.float32) + b2_ref[0]
    h2 = _layernorm(h1 + ff, ln2g_ref[0], ln2b_ref[0], 1e-12)

    h_ref[...] = h2

    @pl.when(l == pl.num_programs(1) - 1)
    def _():
        o_ref[0] = h2.astype(o_ref.dtype)


# --------------------------------------------------------------------------
# kernel 3: head (feed_forward Linear -> self.layer_norm -> classification),
# tiled over the vocabulary.
# --------------------------------------------------------------------------
def head_kernel(feat_ref, ffw_ref, ffb_ref, lng_ref, lnb_ref,
                clsw_ref, clsb_ref, o_ref):
    x = feat_ref[...]                                         # [M, E] bf16
    h = jnp.dot(x, ffw_ref[...], preferred_element_type=jnp.float32) + ffb_ref[0]
    h = _layernorm(h, lng_ref[0], lnb_ref[0], 1e-5)
    logits = jnp.dot(h.astype(jnp.bfloat16), clsw_ref[...],
                     preferred_element_type=jnp.float32) + clsb_ref[0]
    o_ref[...] = logits.astype(o_ref.dtype)


# --------------------------------------------------------------------------
# wrapper (glue: embedding gathers, mask construction, flatten/index_select)
# --------------------------------------------------------------------------
def coke_forward(params, src_ids, position_ids, input_mask, mask_pos, cfg):
    B = cfg['batch_size']
    S = cfg['max_seq_len']
    E = cfg['hidden_size']
    H = cfg['num_attention_heads']
    I = cfg['intermediate_size']
    V = cfg['vocab_size']
    L = cfg['num_hidden_layers']
    assert E % H == 0, "hidden_size must be divisible by num_attention_heads"
    dh = E // H

    # additive float attn mask bmm(mask, mask^T): [B, S, S] (heads broadcast
    # inside the kernel -- never materialize [B, H, S, S])
    m = jnp.squeeze(input_mask, axis=1).astype(jnp.float32)   # [B, S, 1]
    attn_mask = jnp.einsum('bsx,btx->bst', m, m)              # [B, S, S]

    # embeddings (gather is glue)
    src = jnp.squeeze(src_ids, axis=-1)                       # [B, S]
    pos = jnp.squeeze(position_ids, axis=-1)                  # [B, S]
    emb = params['word_emb'][src] + params['pos_emb'][pos]    # [B, S, E] bf16
    emb = emb.reshape(B * S, E)

    # LayerNorm on embeddings, row-tiled; dropout = identity
    BS = B * S
    TR = 256 if BS % 256 == 0 else (8 if BS % 8 == 0 else BS)
    emb_ln = pl.pallas_call(
        embed_ln_kernel,
        out_shape=jax.ShapeDtypeStruct((BS, E), jnp.bfloat16),
        grid=(BS // TR,),
        in_specs=[pl.BlockSpec((TR, E), lambda i: (i, 0)),
                  pl.BlockSpec((1, E), lambda i: (0, 0)),
                  pl.BlockSpec((1, E), lambda i: (0, 0))],
        out_specs=pl.BlockSpec((TR, E), lambda i: (i, 0)),
        compiler_params=pltpu.CompilerParams(
            dimension_semantics=("parallel",),
            vmem_limit_bytes=_vmem_limit(2 * TR * E * 2 + 2 * E * 4)),
    )(emb, params['ln_g'], params['ln_b'])
    x = emb_ln.reshape(B, S, E)

    # fused L-layer transformer encoder: grid = (batch, layer)
    enc = params['enc']
    enc_block_bytes = (
        2 * S * E * 2 + S * S * 4 + S * E * 4 +               # x, out, mask, scratch
        (3 * E * E + E * E + E * I + I * E) * 2 +             # bf16 weights per layer
        (3 * E + 6 * E + I) * 4)                              # f32 biases / LN params
    enc_out = pl.pallas_call(
        functools.partial(encoder_stack_kernel, n_head=H),
        out_shape=jax.ShapeDtypeStruct((B, S, E), jnp.bfloat16),
        grid=(B, L),
        in_specs=[
            pl.BlockSpec((1, S, E), lambda b, l: (b, 0, 0)),            # x
            pl.BlockSpec((1, S, S), lambda b, l: (b, 0, 0)),            # mask
            pl.BlockSpec((1, H, E, 3 * dh), lambda b, l: (l, 0, 0, 0)),  # wqkv
            pl.BlockSpec((1, H, 1, 3 * dh), lambda b, l: (l, 0, 0, 0)),  # bqkv
            pl.BlockSpec((1, H, dh, E), lambda b, l: (l, 0, 0, 0)),      # wo
            pl.BlockSpec((1, 1, E), lambda b, l: (l, 0, 0)),             # bo
            pl.BlockSpec((1, 1, E), lambda b, l: (l, 0, 0)),             # ln1g
            pl.BlockSpec((1, 1, E), lambda b, l: (l, 0, 0)),             # ln1b
            pl.BlockSpec((1, E, I), lambda b, l: (l, 0, 0)),             # w1
            pl.BlockSpec((1, 1, I), lambda b, l: (l, 0, 0)),             # b1
            pl.BlockSpec((1, I, E), lambda b, l: (l, 0, 0)),             # w2
            pl.BlockSpec((1, 1, E), lambda b, l: (l, 0, 0)),             # b2
            pl.BlockSpec((1, 1, E), lambda b, l: (l, 0, 0)),             # ln2g
            pl.BlockSpec((1, 1, E), lambda b, l: (l, 0, 0)),             # ln2b
        ],
        out_specs=pl.BlockSpec((1, S, E), lambda b, l: (b, 0, 0)),
        scratch_shapes=[pltpu.VMEM((S, E), jnp.float32)],
        compiler_params=pltpu.CompilerParams(
            dimension_semantics=("parallel", "arbitrary"),
            vmem_limit_bytes=_vmem_limit(enc_block_bytes)),
    )(x, attn_mask,
      enc['wqkv'], enc['bqkv'], enc['wo'], enc['bo'],
      enc['ln1g'], enc['ln1b'], enc['w1'], enc['b1'],
      enc['w2'], enc['b2'], enc['ln2g'], enc['ln2b'])

    # flatten in torch order: [S, B, E] -> [S*B, E], then index_select(mask_pos)
    enc_flat = jnp.transpose(enc_out, (1, 0, 2)).reshape(-1, E)
    mask_feat = enc_flat[mask_pos.reshape(-1)]                # [M, E] bf16
    M = mask_feat.shape[0]

    # classification head, tiled over vocab (lane-dense output blocks)
    TV = 512 if (V % 512 == 0 and V >= 2048) else (128 if V % 128 == 0 else V)
    head_block_bytes = (M * E * 2 + E * E * 2 + 3 * E * 4
                        + E * TV * 2 + TV * 4 + M * TV * 4)
    out = pl.pallas_call(
        head_kernel,
        out_shape=jax.ShapeDtypeStruct((M, V), jnp.float32),
        grid=(V // TV,),
        in_specs=[
            pl.BlockSpec((M, E), lambda j: (0, 0)),
            pl.BlockSpec((E, E), lambda j: (0, 0)),
            pl.BlockSpec((1, E), lambda j: (0, 0)),
            pl.BlockSpec((1, E), lambda j: (0, 0)),
            pl.BlockSpec((1, E), lambda j: (0, 0)),
            pl.BlockSpec((E, TV), lambda j: (0, j)),
            pl.BlockSpec((1, TV), lambda j: (0, j)),
        ],
        out_specs=pl.BlockSpec((M, TV), lambda j: (0, j)),
        compiler_params=pltpu.CompilerParams(
            dimension_semantics=("parallel",),
            vmem_limit_bytes=_vmem_limit(head_block_bytes)),
    )(mask_feat, params['ff_w'], params['ff_b'],
      params['ln_g'], params['ln_b'],
      params['cls_w'], params['cls_b'])
    return out


# --------------------------------------------------------------------------
# deterministic parameter init (kernel-friendly layouts; bf16 weights,
# f32 biases / LayerNorm params).  Layouts vs. torch:
#   ff_w / cls_w / w1 / w2 : stored [in, out] (pre-transposed)
#   wqkv : [L, H, E, 3*dh]  (per-head q|k|v in-projection, [in, out])
#   wo   : [L, H, dh, E]    (per-head slice of the out-projection, [in, out])
# --------------------------------------------------------------------------
def init_params(key, cfg):
    V = cfg['vocab_size']
    E = cfg['hidden_size']
    P = cfg['max_position_embeddings']
    I = cfg['intermediate_size']
    L = cfg['num_hidden_layers']
    H = cfg['num_attention_heads']
    dh = E // H
    std = 0.02
    ks = jax.random.split(key, 8)

    def nrm(k, shape):
        return (jax.random.normal(k, shape, jnp.float32) * std).astype(jnp.bfloat16)

    params = {
        'word_emb': nrm(ks[0], (V, E)),
        'pos_emb': nrm(ks[1], (P, E)),
        'ln_g': jnp.ones((1, E), jnp.float32),
        'ln_b': jnp.zeros((1, E), jnp.float32),
        'ff_w': nrm(ks[2], (E, E)),
        'ff_b': jnp.zeros((1, E), jnp.float32),
        'cls_w': nrm(ks[3], (E, V)),
        'cls_b': jnp.zeros((1, V), jnp.float32),
        'enc': {
            'wqkv': nrm(ks[4], (L, H, E, 3 * dh)),
            'bqkv': jnp.zeros((L, H, 1, 3 * dh), jnp.float32),
            'wo':   nrm(ks[5], (L, H, dh, E)),
            'bo':   jnp.zeros((L, 1, E), jnp.float32),
            'ln1g': jnp.ones((L, 1, E), jnp.float32),
            'ln1b': jnp.zeros((L, 1, E), jnp.float32),
            'w1':   nrm(ks[6], (L, E, I)),
            'b1':   jnp.zeros((L, 1, I), jnp.float32),
            'w2':   nrm(ks[7], (L, I, E)),
            'b2':   jnp.zeros((L, 1, E), jnp.float32),
            'ln2g': jnp.ones((L, 1, E), jnp.float32),
            'ln2b': jnp.zeros((L, 1, E), jnp.float32),
        },
    }
    return params


if __name__ == "__main__":
    cfg = dict(batch_size=2, max_seq_len=8, hidden_size=32,
               num_hidden_layers=2, num_attention_heads=4,
               vocab_size=256, num_relations=8,
               max_position_embeddings=16,
               attention_probs_dropout_prob=0.1,
               intermediate_size=64)

    key = jax.random.PRNGKey(0)
    pkey, ikey = jax.random.split(key)
    params = init_params(pkey, cfg)

    B, S = cfg['batch_size'], cfg['max_seq_len']
    src_ids = jax.random.randint(ikey, (B, S, 1), 0, cfg['vocab_size'],
                                 dtype=jnp.int32)
    position_ids = jnp.broadcast_to(
        jnp.arange(S, dtype=jnp.int32)[None, :, None], (B, S, 1))
    lengths = jnp.array([S, S - 2], jnp.int32)
    valid = (jnp.arange(S)[None, :] < lengths[:, None]).astype(jnp.float32)
    input_mask = valid[:, None, :, None]                      # [B, 1, S, 1]
    # MASK token at sequence position 2 for every example; rows of the
    # [S*B, E] flat encoder output are indexed as s*B + b.
    mask_pos = (2 * B + jnp.arange(B, dtype=jnp.int32))[:, None]   # [B, 1]

    out = coke_forward(params, src_ids, position_ids, input_mask, mask_pos, cfg)
    out = jax.block_until_ready(out)
    assert out.shape == (B, cfg['vocab_size'])
    assert bool(jnp.all(jnp.isfinite(out)))
    print("KERNEL_OK")
</pallas_src>

<mosaic_0001>
module attributes {stable_mosaic.version = 11 : i64} {
  func.func @embed_ln_kernel(%arg0: i32, %arg1: memref<8x32xbf16, #tpu.memory_space<vmem>>, %arg2: memref<1x32xf32, #tpu.memory_space<vmem>>, %arg3: memref<1x32xf32, #tpu.memory_space<vmem>>, %arg4: memref<8x32xbf16, #tpu.memory_space<vmem>>) attributes {dimension_semantics = [#tpu.dimension_semantics<parallel>], iteration_bounds = array<i64: 2>, scalar_prefetch = 0 : i64, scratch_operands = 0 : i64, tpu.core_type = #tpu.core_type<tc>, window_params = [{transform_indices = @transform_0, window_bounds = array<i64: 8, 32>}, {pipeline_mode = #tpu.pipeline_mode<synchronous>, transform_indices = @transform_1, window_bounds = array<i64: 1, 32>}, {pipeline_mode = #tpu.pipeline_mode<synchronous>, transform_indices = @transform_2, window_bounds = array<i64: 1, 32>}, {transform_indices = @transform_3, window_bounds = array<i64: 8, 32>}]} {
    %c0 = arith.constant 0 : index
    %c0_0 = arith.constant 0 : index
    %0 = vector.load %arg1[%c0, %c0_0] : memref<8x32xbf16, #tpu.memory_space<vmem>>, vector<8x32xbf16>
    %1 = arith.extf %0 : vector<8x32xbf16> to vector<8x32xf32>
    %c0_1 = arith.constant 0 : index
    %c0_2 = arith.constant 0 : index
    %2 = vector.load %arg2[%c0_1, %c0_2] : memref<1x32xf32, #tpu.memory_space<vmem>>, vector<1x32xf32>
    %3 = vector.shape_cast %2 : vector<1x32xf32> to vector<32xf32>
    %c0_3 = arith.constant 0 : index
    %c0_4 = arith.constant 0 : index
    %4 = vector.load %arg3[%c0_3, %c0_4] : memref<1x32xf32, #tpu.memory_space<vmem>>, vector<1x32xf32>
    %5 = vector.shape_cast %4 : vector<1x32xf32> to vector<32xf32>
    %cst = arith.constant dense<0.000000e+00> : vector<8xf32>
    %6 = vector.multi_reduction <add>, %1, %cst [1] : vector<8x32xf32> to vector<8xf32>
    %7 = vector.shape_cast %6 : vector<8xf32> to vector<8x1xf32>
    %cst_5 = arith.constant 3.200000e+01 : f32
    %8 = vector.broadcast %cst_5 : f32 to vector<8x1xf32>
    %9 = arith.divf %7, %8 : vector<8x1xf32>
    %10 = vector.broadcast %9 : vector<8x1xf32> to vector<8x32xf32>
    %11 = arith.subf %1, %10 : vector<8x32xf32>
    %12 = arith.mulf %11, %11 : vector<8x32xf32>
    %cst_6 = arith.constant dense<0.000000e+00> : vector<8xf32>
    %13 = vector.multi_reduction <add>, %12, %cst_6 [1] : vector<8x32xf32> to vector<8xf32>
    %14 = vector.shape_cast %13 : vector<8xf32> to vector<8x1xf32>
    %cst_7 = arith.constant 3.200000e+01 : f32
    %15 = vector.broadcast %cst_7 : f32 to vector<8x1xf32>
    %16 = arith.divf %14, %15 : vector<8x1xf32>
    %17 = vector.broadcast %9 : vector<8x1xf32> to vector<8x32xf32>
    %18 = arith.subf %1, %17 : vector<8x32xf32>
    %cst_8 = arith.constant 9.99999974E-6 : f32
    %19 = vector.broadcast %cst_8 : f32 to vector<8x1xf32>
    %20 = arith.addf %16, %19 : vector<8x1xf32>
    %21 = math.rsqrt %20 : vector<8x1xf32>
    %22 = vector.broadcast %21 : vector<8x1xf32> to vector<8x32xf32>
    %23 = arith.mulf %18, %22 : vector<8x32xf32>
    %24 = vector.shape_cast %3 : vector<32xf32> to vector<1x32xf32>
    %25 = vector.broadcast %24 : vector<1x32xf32> to vector<8x32xf32>
    %26 = arith.mulf %23, %25 : vector<8x32xf32>
    %27 = vector.shape_cast %5 : vector<32xf32> to vector<1x32xf32>
    %28 = vector.broadcast %27 : vector<1x32xf32> to vector<8x32xf32>
    %29 = arith.addf %26, %28 : vector<8x32xf32>
    %30 = arith.truncf %29 : vector<8x32xf32> to vector<8x32xbf16>
    %c0_9 = arith.constant 0 : index
    %c0_10 = arith.constant 0 : index
    %31 = vector.load %arg4[%c0_9, %c0_10] : memref<8x32xbf16, #tpu.memory_space<vmem>>, vector<8x32xbf16>
    tpu.vector_store %arg4[%c0_9, %c0_10], %30 {strides = array<i32>} : memref<8x32xbf16, #tpu.memory_space<vmem>>, vector<8x32xbf16>,
    return
  }
  func.func @transform_0(%arg0: i32) -> (i32, i32) {
    %c0_i32 = arith.constant 0 : i32
    %c0_i32_0 = arith.constant 0 : i32
    return %arg0, %c0_i32 : i32, i32
  }
  func.func @transform_1(%arg0: i32) -> (i32, i32) {
    %c0_i32 = arith.constant 0 : i32
    %c0_i32_0 = arith.constant 0 : i32
    %c0_i32_1 = arith.constant 0 : i32
    return %c0_i32, %c0_i32_0 : i32, i32
  }
  func.func @transform_2(%arg0: i32) -> (i32, i32) {
    %c0_i32 = arith.constant 0 : i32
    %c0_i32_0 = arith.constant 0 : i32
    %c0_i32_1 = arith.constant 0 : i32
    return %c0_i32, %c0_i32_0 : i32, i32
  }
  func.func @transform_3(%arg0: i32) -> (i32, i32) {
    %c0_i32 = arith.constant 0 : i32
    %c0_i32_0 = arith.constant 0 : i32
    return %arg0, %c0_i32 : i32, i32
  }
}

</mosaic_0001>

<bundles_post_ra>
// kernel: tpu_custom_call.1
= control target key start
LH: loop header
LB: loop body
LE: loop exit
PB: predicated region body
PF: predicated region fallthrough
CT: control target
= control target key end

     0   :  { %8 = vsyncpa [#allocation3], 0  ;;  %s655_s0 = inlined_call_operand.hbm [shape: bf16[16,32], index: 0, kind: input, shape index: {}]   ;;  %s656_s1 = inlined_call_operand.vmem [shape: f32[1,32], index: 1, kind: input, shape index: {}]   ;;  %s657_s2 = inlined_call_operand.vmem [shape: f32[1,32], index: 2, kind: input, shape index: {}]   ;;  %s658_s3 = inlined_call_operand.hbm [shape: bf16[16,32], index: 3, kind: output, shape index: {}]  }
   0x1   :  { %10 = vsyncpa [#allocation3 + $0x1], 0 }
   0x2   :  { %11 = vsyncpa [#allocation4], 0 }
   0x3   :  { %13 = vsyncpa [#allocation4 + $0x1], 0  ;;  %s488_s12 = smov 0   ;;  %s490_s13 = smov 0  }
   0x4   :  { %s492_s14 = smov 0   ;;  %s494_s15 = smov 0  }
   0x5 LB: > { %s509_s16 = sadd.s32 4294967295, %s464_s15   ;;  %s306_s17 = sadd.s32 4294967294, %s464_s15   ;;  %s464_s15 = sphi %s494_s15, %s673_s15   ;;  %s460_s14 = sphi %s492_s14, %s672_s14   ;;  %s456_s13 = sphi %s490_s13, %s671_s13   ;;  %s452_s12 = sphi %s488_s12, %s670_s12  }
   0x6   : > { %s513_s18 = sadd.s32 1, %s464_s15   ;;  %s26_s19 = sadd.s32 1, %s460_s14 }
   0x7   : > { %s23_s20 = ssub.s32 %s464_s15, %s513_s18  ;;  %p33_p0 = scmp.ne.s32.totalorder %s460_s14, %s456_s13 }
   0x8   : > { %p24_p1 = scmp.eq.s32.totalorder %s23_s20, 0  ;;  %p34_p2 = scmp.eq.s32.totalorder %s464_s15, 0 }
   0x9   : > { %p39_p3 = scmp.ne.s32.totalorder %s456_s13, %s452_s12  ;;  %p40_p4 = scmp.eq.s32.totalorder %s509_s16, 0 }
   0xa   : > { %s525_s21 = scalar_select %p24_p1, %s460_s14, %s26_s19  }
   0xb   : > { %p527_p5 = por %p34_p2, %p33_p0  ;;  %p531_p6 = por %p40_p4, %p39_p3 }
   0xc   : > { %p105_p7 = scmp.eq.s32.totalorder %s509_s16, 1  ;;  %p111_p8 = scmp.eq.s32.totalorder %s306_s17, 1 }
   0xd   : > { %p332_p10 = scmp.lt.s32.totalorder %s464_s15, 2  ;;  %s137_s26 = sand.u32 1, %s460_s14  }
   0xe   : > { %p538_p11 = por %p105_p7, %p33_p0  ;;  %p542_p12 = por %p111_p8, %p39_p3 }
   0xf   : > { %s310_s27 = sshll.u32 %s464_s15, 6  ;;  %s309_s28 = sshll.u32 %s137_s26, 2 }
  0x10   : > { %s662_s24 = scalar_select %p538_p11, 1, 0 }
  0x11   : > { %s663_s25 = scalar_select %p542_p12, 1, 0 }
  0x12   : > { %s551_s4 = scalar_lea.hbm %s655_s0, %s310_s27  ;;  %s141_s5 = scalar_lea.vmem [#allocation2], %s309_s28 }
  0x13   : > { %s148_s6 = sshll.u32 %s141_s5, 4  ;;  %p555_p13 = pnand %p332_p10, %p527_p5  ;;  %s559_s6 = int_to_ptr.vmem [resolvable:$true] %s148_s6 }
  0x14   : > { %s138_s8 = scalar_lea.sflag [#allocation3], %s137_s26  ;;  %s368_s9 = scalar_lea.hbm %s551_s4, 64 }
  0x15   : > { %p369_p2 = scmp.ne.s32.totalorder %s551_s4, %s368_s9  ;;  %p370_p3 = pneg %p555_p13 }
  0x16   : > { %s373_s17 = scalar_lea.hbm %s655_s0, 128  ;;  %p374_p5 = scmp.lt.u32.totalorder %s551_s4, %s655_s0 }
  0x17   : > { %p371_p4 = pnand %p370_p3, %p369_p2  ;;  %p375_p8 = scmp.lt.u32.totalorder %s373_s17, %s368_s9 }
  0x18   : > { %p377_p9 = scmp.lt.u32.totalorder %s368_s9, %s551_s4 }
  0x19   : > { %p372_p7 = pneg %p371_p4  ;;  %p376_p10 = por %p375_p8, %p374_p5 }
  0x1b   : > { %p378_p0 = por %p377_p9, %p376_p10 }
  0x1d   : > { %p379_p1 = pnand %p378_p0, %p372_p7 }
  0x1f   : > { %382 = shalt.err (!%p379_p1)
}
  0x20   : > { %s383_s22 = scalar_lea.vmem %s559_s6, 64  ;;  %s466_s26 = smov [#allocation2]  }
  0x21   : > { %p384_p2 = scmp.ne.s32.totalorder %s559_s6, %s383_s22  ;;  %s388_s27 = sshll.u32 %s466_s26, 4  ;;  %s389_s27 = int_to_ptr.vmem [resolvable:$false] %s388_s27 }
  0x22   : > { %s390_s28 = scalar_lea.vmem %s389_s27, 128  ;;  %p391_p11 = scmp.lt.s32.totalorder %s559_s6, %s389_s27 }
  0x23   : > { %p386_p4 = pnand %p384_p2, %p370_p3  ;;  %p392_p5 = scmp.lt.s32.totalorder %s390_s28, %s383_s22 }
  0x25   : > { %p387_p12 = pneg %p386_p4  ;;  %p393_p8 = por %p392_p5, %p391_p11 }
  0x27   : > { %p394_p9 = pnand %p393_p8, %p387_p12 }
  0x29   : > { %397 = shalt.err (!%p394_p9)
}
  0x2a   : > { %327 = dma.hbm_to_vmem [thread:$0]  (!%p555_p13), %s551_s4, 64, %s559_s6, %s138_s8  }
  0x2b   : > { %p665_p0 = scmp.lt.s32.totalorder %s464_s15, 3  ;;  %p666_p1 = scmp.ge.s32.totalorder %s464_s15, 1 }
  0x2d   : > { %p154_p3 = pnand %p666_p1, %p665_p0 }
  0x2e   : > { %s593_s29 = sand.u32 (!%p154_p3), 1, %s456_s13  }
  0x2f   : > { %157 = sbr.rel (%p154_p3) target bundleno = 387 (0x183), region = 32  ;;  %s312_s30 = sshll.u32 (!%p154_p3), %s593_s29, 2 }
  0x30   : > { %s160_s5 = scalar_lea.sflag (!%p154_p3), [#allocation3], %s593_s29  ;;  %s163_s9 = scalar_lea.vmem (!%p154_p3), [#allocation2], %s312_s30 }
  0x36   : > { %443 = dma.done.wait (%p531_p6), %s160_s5, 64  }
  0x37   : > { %445 = vsyncadd (%p531_p6), %s160_s5, 4294967232  ;;  %v186_v0 = vld [vmem:[%s163_s9] sm:$0xf]  ;;  %vm190_vm0 = vcmask 261120   ;;  %s317_s8 = sshll.u32 %s509_s16, 6  ;;  %s185_s10 = scalar_lea.vmem [#allocation5], %s312_s30 }
  0x38   : > { %v187_v1 = vunpack.c.l.bf16 %v186_v0  ;;  %v314_v12 = vld [vmem:[%s656_s1] ss:$0 sm:$0xff]  ;;  %s236_s11 = sshll.u32 %s185_s10, 4  ;;  %vm220_vm1 = vcmask 257024   ;;  %s611_s20 = scalar_lea.hbm %s658_s3, %s317_s8  ;;  %s613_s11 = int_to_ptr.vmem [resolvable:$true] %s236_s11 }
  0x39   : > { %v315_v14 = vld [vmem:[%s657_s2] ss:$0 sm:$0xff]  ;;  %s223_s22 = scalar_lea.sflag [#allocation4], %s593_s29  ;;  %s398_s26 = scalar_lea.vmem %s613_s11, 64 }
  0x3a   : > { %v191_v2 = vsel %vm190_vm0, %v187_v1, 0.0  ;;  %p399_p6 = scmp.ne.s32.totalorder %s613_s11, %s398_s26  ;;  %p667_p11 = scmp.ne.s32.totalorder %s662_s24, 0 }
  0x3b   : > { %192 = vadd.xlane.f32.xlu0 %v191_v2  ;;  %s467_s16 = smov [#allocation5]  }
  0x3c   : > { %p400_p12 = pnand %p399_p6, %p667_p11  ;;  %s402_s27 = sshll.u32 %s467_s16, 4  ;;  %s403_s27 = int_to_ptr.vmem [resolvable:$false] %s402_s27 }
  0x3d   : > { %s404_s28 = scalar_lea.vmem %s403_s27, 128  ;;  %p405_p7 = scmp.lt.s32.totalorder %s613_s11, %s403_s27 }
  0x3e   : > { %p401_p13 = pneg %p400_p12  ;;  %p406_p10 = scmp.lt.s32.totalorder %s404_s28, %s398_s26 }
  0x40   : > { %p407_p2 = por %p406_p10, %p405_p7 }
  0x42   : > { %p408_p4 = pnand %p407_p2, %p401_p13 }
  0xc8   : > { %v193_v3 = vpop.xlane.xlu0 %192 }
  0xc9   : > { %v195_v4 = vmul.f32 0.03125, %v193_v3 }
  0xcb   : > { %v196_v5 = vsub.f32 %v187_v1, %v195_v4 }
  0xcd   : > { %v197_v6 = vmul.f32 %v196_v5, %v196_v5 }
  0xcf   : > { %v198_v7 = vsel %vm190_vm0, %v197_v6, 0.0 }
  0xd0   : > { %199 = vadd.xlane.f32.xlu0 %v198_v7 }
 0x15d   : > { %v200_v8 = vpop.xlane.xlu0 %199 }
 0x15e   : > { %v201_v9 = vmul.f32 0.03125, %v200_v8 }
 0x160   : > { %v202_v10 = vadd.f32 1e-05, %v201_v9 }
 0x162   : > { %366 = vrsqrt.f32 %v202_v10 }
 0x16c   : > { %v367_v11 = vpop.eup %366 }
 0x16d   : > { %v204_v13 = vmul.f32 %v367_v11, %v196_v5 }
 0x16f   : > { %v211_v15 = vmul.f32 %v314_v12, %v204_v13 }
 0x171   : > { %v218_v16 = vadd.f32 %v315_v14, %v211_v15 }
 0x173   : > { %v219_v17 = vpack.c.bf16 %v218_v16, %v218_v16 }
 0x175   : > { %221 = vst.msk [vmem:[%s185_s10] sm:$0xf] %vm220_vm1, %v219_v17 }
 0x176   : > { %411 = shalt.err (!%p408_p4)
}
 0x177   : > { %s412_s29 = scalar_lea.hbm %s611_s20, 64  ;;  %s416_s9 = scalar_lea.hbm %s658_s3, 128 }
 0x178   : > { %p413_p5 = scmp.ne.s32.totalorder %s611_s20, %s412_s29  ;;  %p417_p0 = scmp.lt.u32.totalorder %s611_s20, %s658_s3 }
 0x179   : > { %p418_p1 = scmp.lt.u32.totalorder %s416_s9, %s412_s29  ;;  %p420_p6 = scmp.lt.u32.totalorder %s412_s29, %s611_s20 }
 0x17a   : > { %p414_p8 = pnand %p413_p5, %p667_p11 }
 0x17b   : > { %p419_p3 = por %p418_p1, %p417_p0 }
 0x17c   : > { %p415_p9 = pneg %p414_p8 }
 0x17d   : > { %p421_p12 = por %p420_p6, %p419_p3 }
 0x17f   : > { %p422_p13 = pnand %p421_p12, %p415_p9 }
 0x181   : > { %425 = shalt.err (!%p422_p13)
}
 0x182   : > { %322 = dma.vmem_to_hbm [thread:$0]  (%p667_p11), %s613_s11, 64, %s611_s20, %s223_s22  }
 0x183 PF: > { %s248_s6 = sand.u32 1, %s452_s12   ;;  %p668_p7 = scmp.ne.s32.totalorder %s663_s25, 0 }
 0x184   : > { %p669_p10 = scmp.ge.s32.totalorder %s464_s15, 2  ;;  %s249_s7 = scalar_lea.sflag [#allocation4], %s248_s6 }
 0x186   : > { %p329_p2 = pnand %p669_p10, %p668_p7 }
 0x188   : > { %447 = dma.done.wait (!%p329_p2), %s249_s7, 64  }
 0x189   : > { %449 = vsyncadd (!%p329_p2), %s249_s7, 4294967232  ;;  %p16_p4 = scmp.ge.s32.totalorder %s513_s18, 4   ;;  %s670_s12 = smov %s456_s13 }
 0x18a   : > { %s671_s13 = smov %s460_s14  ;;  %s672_s14 = smov %s525_s21 }
 0x18b   : > { %s673_s15 = smov %s513_s18  ;;  %18 = sbr.rel (!%p16_p4) target bundleno = 5 (0x5), region = 77 }
 0x192   :  { %254 = vsyncpa [#allocation3], 1 }
 0x193   :  { %256 = vsyncpa [#allocation3 + $0x1], 1 }
 0x194   :  { %257 = vsyncpa [#allocation4], 1 }
 0x195   :  { %259 = vsyncpa [#allocation4 + $0x1], 1 }

</bundles_post_ra>
